<compile_context>
chip_gen: v7x
topology: tpu7x:2x2x1
jax: 0.10.0
libtpu: 0.0.40
codegen_flags: <defaults>
</compile_context>

<pallas_src>
import functools

import numpy as np

import jax
import jax.numpy as jnp
from jax.experimental import pallas as pl
from jax.experimental.pallas import tpu as pltpu


def _avg_matmul_kernel(a_ref, x_ref, o_ref, *, inv_k):
    # a_ref: (L_out, L) constant banded count matrix (resident in VMEM).
    # x_ref: (L, n_tile) input tile (time on sublanes, channels/lanes last).
    # o_ref: (L_out, n_tile) output tile.
    a = a_ref[...]
    x = x_ref[...]
    if x.dtype != a.dtype:
        x = x.astype(a.dtype)
    acc = jnp.dot(a, x, preferred_element_type=jnp.float32)
    o_ref[...] = (acc * inv_k).astype(o_ref.dtype)


def _build_count_matrix(L, kernel_size, stride, pad, l_out, dtype):
    """A[t, j] = #{p in [t*stride, t*stride+K) : clamp(p - pad, 0, L-1) == j}.

    Integer counts (exactly representable even in bf16); the 1/K scale is
    applied after the matmul so accumulation matches a sum-then-divide mean.
    """
    t = np.arange(l_out, dtype=np.int64)[:, None]
    j = np.arange(L, dtype=np.int64)[None, :]
    # Pre-image of original index j in the replicate-padded signal (inclusive).
    lo = np.where(j == 0, 0, j + pad)
    hi = np.where(j == L - 1, L - 1 + 2 * pad, j + pad)
    w_lo = t * stride
    w_hi = t * stride + kernel_size - 1
    cnt = np.maximum(0, np.minimum(w_hi, hi) - np.maximum(w_lo, lo) + 1)
    return jnp.asarray(cnt.astype(np.float32), dtype=dtype)


def _pick_tile(n, prefer=(512, 256, 128)):
    for t in prefer:
        if n % t == 0:
            return t
    return n  # only reached when n is already a multiple of 128


def moving_avg(x, kernel_size, stride):
    """Pallas TPU forward of the PyTorch moving_avg module.

    x: (B, L, C) -> (B, L_out, C); replicate-padded AvgPool1d along time.
    Note: even kernel_size gives L_out = L - 1 (pad = (K-1)//2 on both sides),
    matching the PyTorch Autoformer module exactly.
    """
    B, L, C = x.shape
    pad = (kernel_size - 1) // 2
    L_out = (L + 2 * pad - kernel_size) // stride + 1
    assert L_out >= 1, "kernel_size too large for this sequence length"

    a_dtype = jnp.bfloat16 if x.dtype == jnp.bfloat16 else jnp.float32
    a = _build_count_matrix(L, kernel_size, stride, pad, L_out, a_dtype)
    kern = functools.partial(_avg_matmul_kernel, inv_k=1.0 / kernel_size)
    cparams = dict(vmem_limit_bytes=32 * 1024 * 1024)

    if C % 128 == 0:
        # Native-layout path: no wrapper transposes; grid over (batch, channel tiles).
        c_tile = _pick_tile(C)
        grid = (B, C // c_tile)
        return pl.pallas_call(
            kern,
            out_shape=jax.ShapeDtypeStruct((B, L_out, C), x.dtype),
            grid=grid,
            in_specs=[
                pl.BlockSpec((L_out, L), lambda b, j: (0, 0)),
                pl.BlockSpec((None, L, c_tile), lambda b, j: (b, 0, j)),
            ],
            out_specs=pl.BlockSpec((None, L_out, c_tile), lambda b, j: (b, 0, j)),
            compiler_params=pltpu.CompilerParams(
                dimension_semantics=("parallel", "parallel"), **cparams
            ),
        )(a, x)

    # Small / ragged C: fold batch into lanes and pad lanes to a multiple of 128
    # so output stores are full-width (layout plumbing only).
    N = B * C
    x2 = jnp.transpose(x, (1, 0, 2)).reshape(L, N)
    N_pad = ((N + 127) // 128) * 128
    if N_pad != N:
        x2 = jnp.pad(x2, ((0, 0), (0, N_pad - N)))
    n_tile = _pick_tile(N_pad)
    grid = (N_pad // n_tile,)
    out2 = pl.pallas_call(
        kern,
        out_shape=jax.ShapeDtypeStruct((L_out, N_pad), x.dtype),
        grid=grid,
        in_specs=[
            pl.BlockSpec((L_out, L), lambda j: (0, 0)),
            pl.BlockSpec((L, n_tile), lambda j: (0, j)),
        ],
        out_specs=pl.BlockSpec((L_out, n_tile), lambda j: (0, j)),
        compiler_params=pltpu.CompilerParams(
            dimension_semantics=("parallel",), **cparams
        ),
    )(a, x2)
    out2 = out2[:, :N]
    return jnp.transpose(out2.reshape(L_out, B, C), (1, 0, 2))


def _reference_moving_avg(x, kernel_size, stride):
    # Pure-JAX reference mirroring the PyTorch module.
    pad = (kernel_size - 1) // 2
    front = jnp.repeat(x[:, 0:1, :], pad, axis=1)
    end = jnp.repeat(x[:, -1:, :], pad, axis=1)
    xpad = jnp.concatenate([front, x, end], axis=1)
    L_pad = xpad.shape[1]
    L_out = (L_pad - kernel_size) // stride + 1
    outs = []
    for t in range(L_out):
        outs.append(jnp.mean(xpad[:, t * stride : t * stride + kernel_size, :], axis=1))
    return jnp.stack(outs, axis=1)


if __name__ == "__main__":
    key = jax.random.PRNGKey(0)

    # Snap inputs to bf16-representable values so the window/padding logic is
    # checked exactly regardless of how the MXU handles f32 operands.
    def _snap(a):
        return a.astype(jnp.bfloat16).astype(jnp.float32)

    # Fold-into-lanes path: small channels (C < 128); includes a window larger
    # than the sequence (heavy replicate padding), an even window, and stride>1.
    B, L, C = 2, 16, 8
    x_small = _snap(jax.random.normal(key, (B, L, C), dtype=jnp.float32))
    for ks, st in [(5, 1), (25, 1), (4, 1), (5, 2)]:
        out = jax.block_until_ready(moving_avg(x_small, ks, st))
        ref = _reference_moving_avg(x_small, ks, st)
        assert out.shape == ref.shape, (ks, st, out.shape, ref.shape)
        assert jnp.allclose(out, ref, atol=1e-5, rtol=1e-5), ("mismatch", ks, st)

    # Native-layout path: C is a multiple of 128 (no wrapper transposes).
    x_big = _snap(jax.random.normal(jax.random.PRNGKey(1), (2, 24, 128), jnp.float32))
    out = jax.block_until_ready(moving_avg(x_big, 7, 1))
    ref = _reference_moving_avg(x_big, 7, 1)
    assert out.shape == ref.shape
    assert jnp.allclose(out, ref, atol=1e-5, rtol=1e-5), "mismatch native path"

    print("KERNEL_OK")
</pallas_src>

<mosaic_0001>
module attributes {stable_mosaic.version = 11 : i64} {
  func.func @_avg_matmul_kernel(%arg0: i32, %arg1: memref<16x16xf32, #tpu.memory_space<vmem>>, %arg2: memref<16x128xf32, #tpu.memory_space<vmem>>, %arg3: memref<16x128xf32, #tpu.memory_space<vmem>>) attributes {dimension_semantics = [#tpu.dimension_semantics<parallel>], iteration_bounds = array<i64: 1>, scalar_prefetch = 0 : i64, scratch_operands = 0 : i64, tpu.core_type = #tpu.core_type<tc>, window_params = [{pipeline_mode = #tpu.pipeline_mode<synchronous>, transform_indices = @transform_0, window_bounds = array<i64: 16, 16>}, {transform_indices = @transform_1, window_bounds = array<i64: 16, 128>}, {transform_indices = @transform_2, window_bounds = array<i64: 16, 128>}]} {
    %c0 = arith.constant 0 : index
    %c0_0 = arith.constant 0 : index
    %0 = vector.load %arg1[%c0, %c0_0] : memref<16x16xf32, #tpu.memory_space<vmem>>, vector<16x16xf32>
    %c0_1 = arith.constant 0 : index
    %c0_2 = arith.constant 0 : index
    %1 = vector.load %arg2[%c0_1, %c0_2] : memref<16x128xf32, #tpu.memory_space<vmem>>, vector<16x128xf32>
    %cst = arith.constant dense<0.000000e+00> : vector<16x128xf32>
    %2 = tpu.matmul %0, %1, %cst {dimension_numbers = #tpu.dot_dimension_numbers<[1], [0], [0], [1], [0, 0, 1, 1], [], []>} : vector<16x16xf32>, vector<16x128xf32>, vector<16x128xf32> -> vector<16x128xf32>
    %cst_3 = arith.constant 2.000000e-01 : f32
    %3 = vector.broadcast %cst_3 : f32 to vector<16x128xf32>
    %4 = arith.mulf %2, %3 : vector<16x128xf32>
    %c0_4 = arith.constant 0 : index
    %c0_5 = arith.constant 0 : index
    %5 = vector.load %arg3[%c0_4, %c0_5] : memref<16x128xf32, #tpu.memory_space<vmem>>, vector<16x128xf32>
    tpu.vector_store %arg3[%c0_4, %c0_5], %4 {strides = array<i32>} : memref<16x128xf32, #tpu.memory_space<vmem>>, vector<16x128xf32>,
    return
  }
  func.func @transform_0(%arg0: i32) -> (i32, i32) {
    %c0_i32 = arith.constant 0 : i32
    %c0_i32_0 = arith.constant 0 : i32
    %c0_i32_1 = arith.constant 0 : i32
    return %c0_i32, %c0_i32_0 : i32, i32
  }
  func.func @transform_1(%arg0: i32) -> (i32, i32) {
    %c0_i32 = arith.constant 0 : i32
    %c0_i32_0 = arith.constant 0 : i32
    return %c0_i32, %arg0 : i32, i32
  }
  func.func @transform_2(%arg0: i32) -> (i32, i32) {
    %c0_i32 = arith.constant 0 : i32
    %c0_i32_0 = arith.constant 0 : i32
    return %c0_i32, %arg0 : i32, i32
  }
}

</mosaic_0001>

<bundles_post_ra>
// kernel: tpu_custom_call.1
= control target key start
LH: loop header
LB: loop body
LE: loop exit
PB: predicated region body
PF: predicated region fallthrough
CT: control target
= control target key end

     0   :  { %7 = vsyncpa [#allocation3], 0  ;;  %s307_s0 = inlined_call_operand.hbm [shape: f32[16,16], index: 0, kind: input, shape index: {}]   ;;  %s308_s1 = inlined_call_operand.hbm [shape: f32[16,128], index: 1, kind: input, shape index: {}]   ;;  %s309_s2 = inlined_call_operand.hbm [shape: f32[16,128], index: 2, kind: output, shape index: {}]  }
   0x1   :  { %8 = vsyncpa [#allocation6], 0 }
   0x2   :  { %9 = vsyncpa [#allocation4], 0  ;;  %s242_s9 = smov [#allocation2]   ;;  %s170_s13 = scalar_lea.hbm %s307_s0, 256 }
   0x3   :  { %s15_s10 = sshll.u32 %s242_s9, 4  ;;  %p171_p0 = scmp.ne.s32.totalorder %s307_s0, %s170_s13  ;;  %s16_s10 = int_to_ptr.vmem [resolvable:$true] %s15_s10 }
   0x4   :  { %p174_p1 = scmp.lt.u32.totalorder %s170_s13, %s307_s0 }
   0x6   :  { %p176_p2 = pnand %p174_p1, %p171_p0 }
   0x8   :  { %179 = shalt.err (!%p176_p2)
}
   0x9   :  { %s180_s18 = scalar_lea.vmem %s16_s10, 256  ;;  %p185_p4 = scmp.lt.s32.totalorder %s16_s10, %s16_s10 }
   0xa   :  { %p181_p3 = scmp.ne.s32.totalorder %s16_s10, %s180_s18  ;;  %p186_p5 = scmp.lt.s32.totalorder %s180_s18, %s180_s18 }
   0xc   :  { %p187_p6 = por %p186_p5, %p185_p4 }
   0xe   :  { %p188_p7 = pnand %p187_p6, %p181_p3 }
  0x10   :  { %191 = shalt.err (!%p188_p7)
}
  0x11   :  { %s243_s19 = smov 128   ;;  %s244_s20 = smov 8  }
  0x12   :  { %21 = dma.hbm_to_vmem [thread:$0]  %s307_s0, 256, %s16_s10, [#allocation3], %s243_s19, %s243_s19, %s244_s20  }
  0x13   :  { %s245_s23 = smov [#allocation5]   ;;  %s192_s27 = scalar_lea.hbm %s308_s1, 256 }
  0x14   :  { %s27_s24 = sshll.u32 %s245_s23, 4  ;;  %p193_p8 = scmp.ne.s32.totalorder %s308_s1, %s192_s27  ;;  %s28_s24 = int_to_ptr.vmem [resolvable:$true] %s27_s24 }
  0x15   :  { %p196_p9 = scmp.lt.u32.totalorder %s192_s27, %s308_s1 }
  0x17   :  { %p198_p10 = pnand %p196_p9, %p193_p8 }
  0x19   :  { %201 = shalt.err (!%p198_p10)
}
  0x1a   :  { %s202_s4 = scalar_lea.vmem %s28_s24, 256  ;;  %p207_p12 = scmp.lt.s32.totalorder %s28_s24, %s28_s24 }
  0x1b   :  { %p203_p11 = scmp.ne.s32.totalorder %s28_s24, %s202_s4  ;;  %p208_p13 = scmp.lt.s32.totalorder %s202_s4, %s202_s4 }
  0x1d   :  { %p209_p0 = por %p208_p13, %p207_p12 }
  0x1f   :  { %p210_p1 = pnand %p209_p0, %p203_p11 }
  0x21   :  { %213 = shalt.err (!%p210_p1)
}
  0x22   :  { %33 = dma.hbm_to_vmem [thread:$0]  %s308_s1, 256, %s28_s24, [#allocation6], %s243_s19, %s243_s19, %s244_s20  }
  0x23   :  { %236 = dma.done.wait [#allocation3], 256  }
  0x24   :  { %237 = vsyncadd [#allocation3], 4294967040 }
  0x25   :  { %238 = dma.done.wait [#allocation6], 256  }
  0x26   :  { %239 = vsyncadd [#allocation6], 4294967040  ;;  %vm44_vm0 = vcmask 130048   ;;  %v42_v0 = vld [vmem:[#allocation5] sm:$0xff]  ;;  %v43_v1 = vld [vmem:[#allocation5 + $0x8] sm:$0xff]  ;;  %s246_s6 = smov [#allocation7]  }
  0x27   :  { %v40_v2 = vld [vmem:[#allocation2] sm:$0xff]  ;;  %v161_v3 = vpack.c.bf16 %v43_v1, %v42_v0  ;;  %v41_v4 = vld [vmem:[#allocation2 + $0x8] sm:$0xff]  ;;  %s135_s7 = sshll.u32 %s246_s6, 4  ;;  %s136_s7 = int_to_ptr.vmem [resolvable:$true] %s135_s7 }
  0x28   :  { %158 = vmatprep.mubr.msk.f32.mxu0 %vm44_vm0, %v40_v2  ;;  %s214_s1 = scalar_lea.vmem %s136_s7, 256  ;;  %p219_p3 = scmp.lt.s32.totalorder %s136_s7, %s136_s7 }
  0x29   :  { %162 = vmatprep.subr.bf16.mxu0 %v161_v3  ;;  %p215_p2 = scmp.ne.s32.totalorder %s136_s7, %s214_s1  ;;  %p220_p4 = scmp.lt.s32.totalorder %s214_s1, %s214_s1 }
  0x2a   :  { %164 = vmatpush3.bf16.msra.mxu0 %v161_v3 }
  0x2b   :  { %p221_p5 = por %p220_p4, %p219_p3 }
  0x2d   :  { %159 = vmatmul.mubr.msk.f32.vlgmr.msra.gmra.mrb[0].mxu0 %vm44_vm0, %v41_v4  ;;  %p222_p6 = pnand %p221_p5, %p215_p2 }
 0x100   :  { %v160_v5 = vpop.f32.mrb[0].mxu0 }
 0x101   :  { %v127_v6 = vmul.f32 0.2, %v160_v5  ;;  %v117_v7 = vpop.f32.mrb[1].mxu0 }
 0x102   :  { %v126_v8 = vmul.f32 0.2, %v117_v7 }
 0x103   :  { %129 = vst [vmem:[#allocation7 + $0x8] sm:$0xff] %v127_v6 }
 0x104   :  { %128 = vst [vmem:[#allocation7] sm:$0xff] %v126_v8 }
 0x105   :  { %225 = shalt.err (!%p222_p6)
}
 0x106   :  { %s226_s10 = scalar_lea.hbm %s309_s2, 256 }
 0x107   :  { %p227_p7 = scmp.ne.s32.totalorder %s309_s2, %s226_s10  ;;  %p230_p8 = scmp.lt.u32.totalorder %s226_s10, %s309_s2 }
 0x109   :  { %p232_p9 = pnand %p230_p8, %p227_p7 }
 0x10b   :  { %235 = shalt.err (!%p232_p9)
}
 0x10c   :  { %141 = dma.vmem_to_hbm [thread:$0]  %s136_s7, 256, %s309_s2, [#allocation4], %s243_s19, %s243_s19, %s244_s20  }
 0x10d   :  { %240 = dma.done.wait [#allocation4], 256  }
 0x10e   :  { %241 = vsyncadd [#allocation4], 4294967040 }
 0x10f   :  { %145 = vsyncpa [#allocation3], 1 }
 0x110   :  { %146 = vsyncpa [#allocation6], 1 }
 0x111   :  { %147 = vsyncpa [#allocation4], 1 }

</bundles_post_ra>
